<compile_context>
chip_gen: v7x
topology: tpu7x:2x2x1
jax: 0.10.0
libtpu: 0.0.40
codegen_flags: <defaults>
</compile_context>

<pallas_src>
import functools
import math

import jax
import jax.numpy as jnp
from jax.experimental import pallas as pl
from jax.experimental.pallas import tpu as pltpu


def _eca_kernel_size(channels, gamma=2, b=1):
    t = int(abs(math.log(channels, 2) + b) / gamma)
    return t if t % 2 else t + 1


def _eca_kernel(w_ref, x_ref, o_ref, *, channels):
    # w_ref: SMEM (k,) f32 conv taps.
    # x_ref / o_ref: VMEM (Bt*C, H*W) block; Bt folded batch elements stacked
    # along the sublane/channel axis, spatial on the lane axis.
    rows, hw = x_ref.shape
    k = w_ref.shape[0]
    pad = k // 2

    # Global average pool over the spatial (lane) axis, f32 accumulation.
    pooled = jnp.sum(x_ref[...], axis=-1, keepdims=True, dtype=jnp.float32)
    pooled = pooled * (1.0 / hw)                                   # (rows, 1)

    # Zero-padded k-tap conv along the channel axis via XLU sublane rolls.
    # Folded batch elements stay independent via the (row % C) edge mask.
    ch = jax.lax.broadcasted_iota(jnp.int32, (rows, 1), 0) % channels
    y = jnp.zeros((rows, 1), jnp.float32)
    for j in range(k):                                             # k <= 9, static unroll
        off = j - pad                                              # source index: c + off
        src = pooled if off == 0 else pltpu.roll(pooled, shift=(-off) % rows, axis=0)
        valid = jnp.logical_and(ch + off >= 0, ch + off < channels)
        y = y + w_ref[j] * jnp.where(valid, src, 0.0)

    attn = jax.nn.sigmoid(y).astype(x_ref.dtype)                   # (rows, 1)
    o_ref[...] = x_ref[...] * attn                                 # broadcast along lanes


def _vmem_budget_bytes():
    try:
        cap = int(pltpu.get_tpu_info().vmem_capacity_bytes)
    except Exception:
        cap = 64 << 20                        # conservative fallback
    if cap <= (64 << 20):                     # v7x: 64 MiB physical -> ~56 MiB usable
        return cap - (8 << 20)
    return min(cap - (16 << 20), 112 << 20)   # v5e/v6e: 128 MiB physical -> ~112 MiB


def _pick_batch_fold(batch, per_item_bytes, budget_bytes):
    """Largest divisor Bt of `batch` such that the double-buffered in+out block
    fits the VMEM budget and (for batch >= 2) the grid keeps >= 2 parallel
    steps so v7x's second TensorCore has work."""
    max_bt = max(1, (budget_bytes - (2 << 20)) // (4 * per_item_bytes))
    if batch >= 2:
        max_bt = min(max_bt, batch // 2)
    max_bt = max(1, min(max_bt, batch))
    bt = 1
    for d in range(1, max_bt + 1):
        if batch % d == 0:
            bt = d
    return bt


def eca_block(x, conv_weight, *, donate_x=False):
    """x: (B, C, H, W); conv_weight: (1, k) = Conv1d(1, 1, k, bias=False) weight."""
    B, C, H, W = x.shape
    k = conv_weight.shape[-1]
    HW = H * W
    itemsize = x.dtype.itemsize
    per_item = C * HW * itemsize

    budget = _vmem_budget_bytes()
    bt = _pick_batch_fold(B, per_item, budget)
    rows = bt * C

    # TODO(synk): if even a bt=1 block (4*C*HW*itemsize) exceeds the VMEM budget
    # (huge feature maps, notably on v7x's 64 MiB), fall back to a channel-tiled
    # one-pass kernel with a +/-(k//2) halo of pooled channels (2x HBM traffic)
    # rather than a two-phase pool+scale sweep (3x traffic).
    needed = 4 * rows * HW * itemsize + (2 << 20)
    vmem_limit = int(min(max(needed, 32 << 20), budget))

    # Metadata-only reshapes: fold bt batch elements along the channel axis,
    # spatial on the lane-dense last axis.
    x2 = x.reshape(B // bt, rows, HW)
    w = conv_weight.reshape(k).astype(jnp.float32)

    out = pl.pallas_call(
        functools.partial(_eca_kernel, channels=C),
        out_shape=jax.ShapeDtypeStruct((B // bt, rows, HW), x.dtype),
        grid_spec=pltpu.PrefetchScalarGridSpec(
            num_scalar_prefetch=0,
            grid=(B // bt,),
            in_specs=[
                pl.BlockSpec(memory_space=pltpu.MemorySpace.SMEM),    # conv taps (k,)
                pl.BlockSpec((None, rows, HW), lambda g: (g, 0, 0)),  # x block, lane-dense
            ],
            out_specs=pl.BlockSpec((None, rows, HW), lambda g: (g, 0, 0)),
        ),
        compiler_params=pltpu.CompilerParams(
            dimension_semantics=("parallel",),
            vmem_limit_bytes=vmem_limit,
        ),
        cost_estimate=pl.CostEstimate(
            flops=2 * B * C * HW + 2 * B * C * k,
            transcendentals=B * C,
            bytes_accessed=2 * B * C * HW * itemsize + k * 4,
        ),
        input_output_aliases={1: 0} if donate_x else {},
    )(w, x2)
    return out.reshape(B, C, H, W)


def eca_reference(x, conv_weight):
    """Pure-JAX reference matching the PyTorch forward."""
    B, C, H, W = x.shape
    k = conv_weight.shape[-1]
    pad = k // 2
    pooled = jnp.mean(x, axis=(2, 3))                       # (B, C)
    padded = jnp.pad(pooled, ((0, 0), (pad, pad)))          # (B, C + 2*pad)
    y = jnp.zeros_like(pooled)
    for j in range(k):
        y = y + conv_weight[0, j] * padded[:, j:j + C]
    attn = jax.nn.sigmoid(y)                                # (B, C)
    return x * attn[:, :, None, None]


if __name__ == "__main__":
    # Small shapes consistent with the module: batch=2, channels=8 -> k=3.
    B, C, H, W = 2, 8, 16, 16
    k = _eca_kernel_size(C)  # == 3 for C=8 (gamma=2, b=1)

    key = jax.random.PRNGKey(0)
    kx, kw = jax.random.split(key)
    x = jax.random.normal(kx, (B, C, H, W), dtype=jnp.float32)

    # Deterministic Conv1d(1, 1, k, bias=False) weight (kaiming-uniform bound 1/sqrt(k)).
    bound = 1.0 / math.sqrt(k)
    conv_weight = jax.random.uniform(
        kw, (1, k), minval=-bound, maxval=bound, dtype=jnp.float32
    )

    out = jax.block_until_ready(eca_block(x, conv_weight))
    ref = eca_reference(x, conv_weight)
    assert out.shape == (B, C, H, W)
    assert jnp.allclose(out, ref, atol=1e-5, rtol=1e-5)

    print("KERNEL_OK")
</pallas_src>

<mosaic_0001>
module attributes {stable_mosaic.version = 11 : i64} {
  func.func @_eca_kernel(%arg0: i32, %arg1: memref<3xf32, #tpu.memory_space<smem>>, %arg2: memref<1x8x256xf32, #tpu.memory_space<vmem>>, %arg3: memref<1x8x256xf32, #tpu.memory_space<vmem>>) attributes {dimension_semantics = [#tpu.dimension_semantics<parallel>], iteration_bounds = array<i64: 2>, scalar_prefetch = 0 : i64, scratch_operands = 0 : i64, tpu.core_type = #tpu.core_type<tc>, window_params = [{transform_indices = @transform_0, window_bounds = array<i64: 3>}, {transform_indices = @transform_1, window_bounds = array<i64: 1, 8, 256>}, {transform_indices = @transform_2, window_bounds = array<i64: 1, 8, 256>}]} {
    %c0 = arith.constant 0 : index
    %c0_0 = arith.constant 0 : index
    %c0_1 = arith.constant 0 : index
    %0 = vector.load %arg2[%c0, %c0_0, %c0_1] : memref<1x8x256xf32, #tpu.memory_space<vmem>>, vector<1x8x256xf32>
    %1 = vector.shape_cast %0 : vector<1x8x256xf32> to vector<8x256xf32>
    %cst = arith.constant dense<0.000000e+00> : vector<8xf32>
    %2 = vector.multi_reduction <add>, %1, %cst [1] : vector<8x256xf32> to vector<8xf32>
    %3 = vector.shape_cast %2 : vector<8xf32> to vector<8x1xf32>
    %cst_2 = arith.constant 3.906250e-03 : f32
    %4 = vector.broadcast %cst_2 : f32 to vector<8x1xf32>
    %5 = arith.mulf %3, %4 : vector<8x1xf32>
    %6 = tpu.iota {dimensions = array<i32: 0>} : vector<8x1xi32>
    %c8_i32 = arith.constant 8 : i32
    %c0_i32 = arith.constant 0 : i32
    %7 = arith.cmpi eq, %c8_i32, %c0_i32 : i32
    %c1_i32 = arith.constant 1 : i32
    %8 = arith.select %7, %c1_i32, %c8_i32 : i32
    %9 = vector.broadcast %8 : i32 to vector<8x1xi32>
    %10 = arith.remsi %6, %9 : vector<8x1xi32>
    %c0_i32_3 = arith.constant 0 : i32
    %11 = vector.broadcast %c0_i32_3 : i32 to vector<8x1xi32>
    %12 = arith.cmpi ne, %10, %11 : vector<8x1xi32>
    %c0_i32_4 = arith.constant 0 : i32
    %13 = vector.broadcast %c0_i32_4 : i32 to vector<8x1xi32>
    %14 = arith.cmpi slt, %10, %13 : vector<8x1xi32>
    %c0_i32_5 = arith.constant 0 : i32
    %15 = arith.cmpi slt, %8, %c0_i32_5 : i32
    %16 = vector.broadcast %15 : i1 to vector<8x1xi1>
    %17 = vector.broadcast %16 : vector<8x1xi1> to vector<8x1xi1>
    %18 = arith.xori %14, %17 : vector<8x1xi1>
    %19 = arith.andi %18, %12 : vector<8x1xi1>
    %20 = vector.broadcast %8 : i32 to vector<8x1xi32>
    %21 = arith.addi %10, %20 : vector<8x1xi32>
    %22 = arith.select %19, %21, %10 : vector<8x1xi1>, vector<8x1xi32>
    %cst_6 = arith.constant 0.000000e+00 : f32
    %23 = vector.broadcast %cst_6 : f32 to vector<8x1xf32>
    %c1_i32_7 = arith.constant 1 : i32
    %24 = tpu.dynamic_rotate %5 by %c1_i32_7 dim 0 : vector<8x1xf32>, i32 -> vector<8x1xf32>
    %c-1_i32 = arith.constant -1 : i32
    %25 = vector.broadcast %c-1_i32 : i32 to vector<8x1xi32>
    %26 = arith.addi %22, %25 : vector<8x1xi32>
    %c0_i32_8 = arith.constant 0 : i32
    %27 = vector.broadcast %c0_i32_8 : i32 to vector<8x1xi32>
    %28 = arith.cmpi sge, %26, %27 : vector<8x1xi32>
    %c-1_i32_9 = arith.constant -1 : i32
    %29 = vector.broadcast %c-1_i32_9 : i32 to vector<8x1xi32>
    %30 = arith.addi %22, %29 : vector<8x1xi32>
    %c8_i32_10 = arith.constant 8 : i32
    %31 = vector.broadcast %c8_i32_10 : i32 to vector<8x1xi32>
    %32 = arith.cmpi slt, %30, %31 : vector<8x1xi32>
    %33 = arith.andi %28, %32 : vector<8x1xi1>
    %c0_11 = arith.constant 0 : index
    %34 = memref.load %arg1[%c0_11] : memref<3xf32, #tpu.memory_space<smem>>
    %cst_12 = arith.constant 0.000000e+00 : f32
    %35 = vector.broadcast %cst_12 : f32 to vector<8x1xf32>
    %36 = arith.select %33, %24, %35 : vector<8x1xi1>, vector<8x1xf32>
    %37 = vector.broadcast %34 : f32 to vector<8x1xf32>
    %38 = arith.mulf %37, %36 : vector<8x1xf32>
    %39 = arith.addf %23, %38 : vector<8x1xf32>
    %c0_i32_13 = arith.constant 0 : i32
    %40 = vector.broadcast %c0_i32_13 : i32 to vector<8x1xi32>
    %41 = arith.addi %22, %40 : vector<8x1xi32>
    %c0_i32_14 = arith.constant 0 : i32
    %42 = vector.broadcast %c0_i32_14 : i32 to vector<8x1xi32>
    %43 = arith.cmpi sge, %41, %42 : vector<8x1xi32>
    %c0_i32_15 = arith.constant 0 : i32
    %44 = vector.broadcast %c0_i32_15 : i32 to vector<8x1xi32>
    %45 = arith.addi %22, %44 : vector<8x1xi32>
    %c8_i32_16 = arith.constant 8 : i32
    %46 = vector.broadcast %c8_i32_16 : i32 to vector<8x1xi32>
    %47 = arith.cmpi slt, %45, %46 : vector<8x1xi32>
    %48 = arith.andi %43, %47 : vector<8x1xi1>
    %c1 = arith.constant 1 : index
    %49 = memref.load %arg1[%c1] : memref<3xf32, #tpu.memory_space<smem>>
    %cst_17 = arith.constant 0.000000e+00 : f32
    %50 = vector.broadcast %cst_17 : f32 to vector<8x1xf32>
    %51 = arith.select %48, %5, %50 : vector<8x1xi1>, vector<8x1xf32>
    %52 = vector.broadcast %49 : f32 to vector<8x1xf32>
    %53 = arith.mulf %52, %51 : vector<8x1xf32>
    %54 = arith.addf %39, %53 : vector<8x1xf32>
    %c7_i32 = arith.constant 7 : i32
    %55 = tpu.dynamic_rotate %5 by %c7_i32 dim 0 : vector<8x1xf32>, i32 -> vector<8x1xf32>
    %c1_i32_18 = arith.constant 1 : i32
    %56 = vector.broadcast %c1_i32_18 : i32 to vector<8x1xi32>
    %57 = arith.addi %22, %56 : vector<8x1xi32>
    %c0_i32_19 = arith.constant 0 : i32
    %58 = vector.broadcast %c0_i32_19 : i32 to vector<8x1xi32>
    %59 = arith.cmpi sge, %57, %58 : vector<8x1xi32>
    %c1_i32_20 = arith.constant 1 : i32
    %60 = vector.broadcast %c1_i32_20 : i32 to vector<8x1xi32>
    %61 = arith.addi %22, %60 : vector<8x1xi32>
    %c8_i32_21 = arith.constant 8 : i32
    %62 = vector.broadcast %c8_i32_21 : i32 to vector<8x1xi32>
    %63 = arith.cmpi slt, %61, %62 : vector<8x1xi32>
    %64 = arith.andi %59, %63 : vector<8x1xi1>
    %c2 = arith.constant 2 : index
    %65 = memref.load %arg1[%c2] : memref<3xf32, #tpu.memory_space<smem>>
    %cst_22 = arith.constant 0.000000e+00 : f32
    %66 = vector.broadcast %cst_22 : f32 to vector<8x1xf32>
    %67 = arith.select %64, %55, %66 : vector<8x1xi1>, vector<8x1xf32>
    %68 = vector.broadcast %65 : f32 to vector<8x1xf32>
    %69 = arith.mulf %68, %67 : vector<8x1xf32>
    %70 = arith.addf %54, %69 : vector<8x1xf32>
    %71 = arith.negf %70 : vector<8x1xf32>
    %72 = math.exp %71 : vector<8x1xf32>
    %cst_23 = arith.constant 1.000000e+00 : f32
    %73 = vector.broadcast %cst_23 : f32 to vector<8x1xf32>
    %74 = arith.addf %73, %72 : vector<8x1xf32>
    %75 = arith.divf %73, %74 : vector<8x1xf32>
    %c0_24 = arith.constant 0 : index
    %c0_25 = arith.constant 0 : index
    %c0_26 = arith.constant 0 : index
    %76 = vector.load %arg2[%c0_24, %c0_25, %c0_26] : memref<1x8x256xf32, #tpu.memory_space<vmem>>, vector<1x8x256xf32>
    %77 = vector.shape_cast %76 : vector<1x8x256xf32> to vector<8x256xf32>
    %78 = vector.broadcast %75 : vector<8x1xf32> to vector<8x256xf32>
    %79 = arith.mulf %77, %78 : vector<8x256xf32>
    %c0_27 = arith.constant 0 : index
    %c0_28 = arith.constant 0 : index
    %c0_29 = arith.constant 0 : index
    %80 = vector.load %arg3[%c0_27, %c0_28, %c0_29] : memref<1x8x256xf32, #tpu.memory_space<vmem>>, vector<1x8x256xf32>
    %81 = vector.shape_cast %80 : vector<1x8x256xf32> to vector<8x256xf32>
    %82 = vector.shape_cast %79 : vector<8x256xf32> to vector<1x8x256xf32>
    tpu.vector_store %arg3[%c0_27, %c0_28, %c0_29], %82 {strides = array<i32>} : memref<1x8x256xf32, #tpu.memory_space<vmem>>, vector<1x8x256xf32>,
    return
  }
  func.func @transform_0(%arg0: i32) -> i32 {
    %c0_i32 = arith.constant 0 : i32
    %c0_i32_0 = arith.constant 0 : i32
    return %c0_i32 : i32
  }
  func.func @transform_1(%arg0: i32) -> (i32, i32, i32) {
    %c0_i32 = arith.constant 0 : i32
    %c0_i32_0 = arith.constant 0 : i32
    %c0_i32_1 = arith.constant 0 : i32
    return %arg0, %c0_i32, %c0_i32_0 : i32, i32, i32
  }
  func.func @transform_2(%arg0: i32) -> (i32, i32, i32) {
    %c0_i32 = arith.constant 0 : i32
    %c0_i32_0 = arith.constant 0 : i32
    %c0_i32_1 = arith.constant 0 : i32
    return %arg0, %c0_i32, %c0_i32_0 : i32, i32, i32
  }
}

</mosaic_0001>

<bundles_post_ra>
// kernel: tpu_custom_call.1
= control target key start
LH: loop header
LB: loop body
LE: loop exit
PB: predicated region body
PF: predicated region fallthrough
CT: control target
= control target key end

     0   :  { %7 = vsyncpa [#allocation5], 0  ;;  %s759_s0 = inlined_call_operand.hbm [shape: f32[3], index: 0, kind: input, shape index: {}]   ;;  %s760_s1 = inlined_call_operand.hbm [shape: f32[2,8,256], index: 1, kind: input, shape index: {}]   ;;  %s761_s2 = inlined_call_operand.hbm [shape: f32[2,8,256], index: 2, kind: output, shape index: {}]  }
   0x1   :  { %8 = vsyncpa [#allocation3], 0 }
   0x2   :  { %10 = vsyncpa [#allocation3 + $0x1], 0 }
   0x3   :  { %11 = vsyncpa [#allocation4], 0 }
   0x4   :  { %13 = vsyncpa [#allocation4 + $0x1], 0  ;;  %s550_s9 = smov 0   ;;  %s552_s10 = smov 0  }
   0x5   :  { %s554_s11 = smov 0   ;;  %s556_s12 = smov 0  }
   0x6 LB: > { %s571_s13 = sadd.s32 4294967295, %s529_s12   ;;  %s332_s14 = sadd.s32 4294967294, %s529_s12   ;;  %s529_s12 = sphi %s556_s12, %s782_s12   ;;  %s525_s11 = sphi %s554_s11, %s781_s11   ;;  %s521_s10 = sphi %s552_s10, %s780_s10   ;;  %s517_s9 = sphi %s550_s9, %s779_s9  }
   0x7   : > { %p60_p0 = scmp.ne.s32.totalorder %s521_s10, %s517_s9  ;;  %p762_p1 = scmp.eq.s32.totalorder %s571_s13, 0 }
   0x8   : > { %p90_p3 = scmp.eq.s32.totalorder %s332_s14, 1  ;;  %p333_p5 = scmp.ge.s32.totalorder %s529_s12, 1 }
   0x9   : > { %p580_p4 = por %p762_p1, %p60_p0  ;;  %p97_p7 = scmp.lt.s32.totalorder %s529_s12, 3 }
   0xa   : > { %p585_p6 = por %p90_p3, %p60_p0  ;;  %s596_s18 = sadd.s32 1, %s529_s12  }
   0xb   : > { %s765_s15 = scalar_select %p580_p4, 1, 0 }
   0xc   : > { %s766_s16 = scalar_select %p585_p6, 1, 0 }
   0xd   : > { %p590_p8 = pnand %p333_p5, %p97_p7  ;;  %s44_s19 = ssub.s32 %s529_s12, %s596_s18 }
   0xe   : > { %s47_s20 = sadd.s32 1, %s525_s11  ;;  %p609_p12 = scmp.eq.s32.totalorder %s44_s19, 0 }
   0xf   : > { %p361_p10 = pneg %p590_p8  ;;  %p54_p13 = scmp.ne.s32.totalorder %s525_s11, %s521_s10 }
  0x10   : > { %p55_p0 = scmp.eq.s32.totalorder %s529_s12, 0  ;;  %p374_p3 = scmp.lt.s32.totalorder %s529_s12, 2 }
  0x11   : > { %p605_p11 = pnand %p361_p10, %p762_p1  ;;  %s416_s25 = scalar_lea.hbm %s759_s0, 16 }
  0x12   : > { %p417_p5 = scmp.ne.s32.totalorder %s759_s0, %s416_s25  ;;  %p423_p1 = scmp.lt.u32.totalorder %s416_s25, %s759_s0 }
  0x13   : > { %p418_p7 = pneg %p605_p11 }
  0x15   : > { %p419_p10 = pnand %p418_p7, %p417_p5 }
  0x17   : > { %p420_p9 = pneg %p419_p10 }
  0x19   : > { %p425_p2 = pnand %p423_p1, %p420_p9 }
  0x1b   : > { %428 = shalt.err (!%p425_p2)
}
  0x1c   : > { %s531_s30 = smov [#allocation2]   ;;  %p56_p1 = por %p55_p0, %p54_p13 }
  0x1d   : > { %364 = dma.hbm_to_smem (!%p605_p11), %s759_s0, 16, %s531_s30, [#allocation5]  }
  0x1e   : > { %s636_s5 = scalar_select %p609_p12, %s525_s11, %s47_s20  }
  0x1f   : > { %p770_p2 = scmp.eq.s32.totalorder %s571_s13, 1  ;;  %s119_s7 = sand.u32 1, %s525_s11  }
  0x20   : > { %s351_s8 = sshll.u32 %s529_s12, 8  ;;  %s336_s14 = sshll.u32 %s119_s7, 4 }
  0x21   : > { %p648_p9 = por %p770_p2, %p54_p13  ;;  %s657_s23 = scalar_lea.hbm %s760_s1, %s351_s8 }
  0x22   : > { %s123_s20 = scalar_lea.vmem [#allocation6], %s336_s14  ;;  %p661_p11 = pnand %p374_p3, %p56_p1 }
  0x23   : > { %s771_s6 = scalar_select %p648_p9, 1, 0 }
  0x24   : > { %s131_s22 = sshll.u32 %s123_s20, 4  ;;  %s120_s25 = scalar_lea.sflag [#allocation3], %s119_s7  ;;  %s665_s22 = int_to_ptr.vmem [resolvable:$true] %s131_s22 }
  0x25   : > { %s429_s26 = scalar_lea.hbm %s657_s23, 256  ;;  %p431_p13 = pneg %p661_p11 }
  0x26   : > { %p430_p12 = scmp.ne.s32.totalorder %s657_s23, %s429_s26  ;;  %s434_s29 = scalar_lea.hbm %s760_s1, 512 }
  0x27   : > { %p435_p3 = scmp.lt.u32.totalorder %s657_s23, %s760_s1  ;;  %p436_p7 = scmp.lt.u32.totalorder %s434_s29, %s429_s26 }
  0x28   : > { %p432_p0 = pnand %p431_p13, %p430_p12  ;;  %p438_p1 = scmp.lt.u32.totalorder %s429_s26, %s657_s23 }
  0x29   : > { %p437_p10 = por %p436_p7, %p435_p3 }
  0x2a   : > { %p433_p5 = pneg %p432_p0 }
  0x2b   : > { %p439_p2 = por %p438_p1, %p437_p10 }
  0x2d   : > { %p440_p6 = pnand %p439_p2, %p433_p5 }
  0x2f   : > { %443 = shalt.err (!%p440_p6)
}
  0x30   : > { %s444_s4 = scalar_lea.vmem %s665_s22, 256  ;;  %s532_s7 = smov [#allocation6]  }
  0x31   : > { %p445_p12 = scmp.ne.s32.totalorder %s665_s22, %s444_s4  ;;  %s449_s8 = sshll.u32 %s532_s7, 4  ;;  %s450_s8 = int_to_ptr.vmem [resolvable:$false] %s449_s8 }
  0x32   : > { %s451_s14 = scalar_lea.vmem %s450_s8, 512  ;;  %p452_p4 = scmp.lt.s32.totalorder %s665_s22, %s450_s8 }
  0x33   : > { %p447_p0 = pnand %p445_p12, %p431_p13  ;;  %p453_p3 = scmp.lt.s32.totalorder %s451_s14, %s444_s4 }
  0x35   : > { %p448_p9 = pneg %p447_p0  ;;  %p454_p7 = por %p453_p3, %p452_p4 }
  0x37   : > { %p455_p10 = pnand %p454_p7, %p448_p9 }
  0x39   : > { %458 = shalt.err (!%p455_p10)
}
  0x3a   : > { %368 = dma.hbm_to_vmem [thread:$0]  (!%p661_p11), %s657_s23, 256, %s665_s22, %s120_s25  }
  0x3b   : > { %140 = sbr.rel (%p590_p8) target bundleno = 399 (0x18f), region = 28  ;;  %p773_p6 = scmp.eq.s32.totalorder (!%p590_p8), %s571_s13, 0 }
  0x42   : > { %504 = dma.done.wait (%p773_p6), [#allocation5], 16   ;;  %p774_p13 = pmov %p773_p6 }
  0x43   : > { %s699_s19 = sand.u32 1, %s521_s10   ;;  %p775_p4 = scmp.ne.s32.totalorder %s765_s15, 0 }
  0x44   : > { %506 = vsyncadd (%p774_p13), [#allocation5], 4294967280  ;;  %s341_s21 = sshll.u32 %s699_s19, 4  ;;  %s147_s20 = scalar_lea.sflag [#allocation3], %s699_s19 }
  0x45   : > { %s150_s23 = scalar_lea.vmem [#allocation6], %s341_s21 }
  0x46   : > { %508 = dma.done.wait (%p775_p4), %s147_s20, 256  }
  0x47   : > { %510 = vsyncadd (%p775_p4), %s147_s20, 4294967040 }
  0x48   : > { %155 = sfence }
  0x49   : > { %v172_v0 = vld [vmem:[%s150_s23] sm:$0xff]  ;;  %v173_v1 = vld [vmem:[%s150_s23 + $0x8] sm:$0xff]  ;;  %v533_v3 = vmov 0   ;;  %v178_v4 = vlaneseq  ;;  %s197_s17 = sld [smem:[#allocation2]]  ;;  %s343_s22 = sld [smem:[#allocation2 + $0x1]] }
  0x4a   : > { %v174_v2 = vadd.f32 %v173_v1, %v172_v0  ;;  %411 = vset.pattern.permute.xlu0 %v533_v3  ;;  %s344_s24 = sld [smem:[#allocation2 + $0x2]]  ;;  %s352_s15 = sshll.u32 %s571_s13, 8 }
  0x4b   : > { %v179_v5 = vshrl.u32 %v178_v4, 7  ;;  %s171_s25 = scalar_lea.vmem [#allocation7], %s341_s21  ;;  %s715_s29 = scalar_lea.hbm %s761_s2, %s352_s15 }
  0x4c   : > { %175 = vadd.xlane.f32.xlu0 %v174_v2  ;;  %s250_s26 = sshll.u32 %s171_s25, 4  ;;  %s236_s30 = scalar_lea.sflag [#allocation4], %s699_s19  ;;  %s717_s26 = int_to_ptr.vmem [resolvable:$true] %s250_s26 }
  0x4d   : > { %v184_v6 = vand.u32 7, %v179_v5  ;;  %s459_s13 = scalar_lea.vmem %s717_s26, 256  ;;  %p776_p9 = scmp.ne.s32.totalorder %s771_s6, 0 }
  0x4e   : > { %p460_p8 = scmp.ne.s32.totalorder %s717_s26, %s459_s13  ;;  %s534_s3 = smov [#allocation7]  }
  0x4f   : > { %v193_v7 = vadd.s32 4294967295, %v184_v6  ;;  %v211_v8 = vadd.s32 1, %v184_v6  ;;  %v199_v11 = vstv %s197_s17  ;;  %v207_v12 = vstv %s343_s22  ;;  %s463_s4 = sshll.u32 %s534_s3, 4  ;;  %s464_s4 = int_to_ptr.vmem [resolvable:$false] %s463_s4 }
  0x50   : > { %v217_v15 = vstv %s344_s24  ;;  %p461_p11 = pnand %p460_p8, %p776_p9  ;;  %s465_s7 = scalar_lea.vmem %s464_s4, 512 }
  0x51   : > { %vm194_vm0 = vcmp.ge.s32.totalorder %v193_v7, 0  ;;  %vm213_vm1 = vcmp.lt.s32.totalorder %v211_v8, 8  ;;  %p466_p1 = scmp.lt.s32.totalorder %s717_s26, %s464_s4  ;;  %p467_p2 = scmp.lt.s32.totalorder %s465_s7, %s459_s13 }
  0x52   : > { %p462_p5 = pneg %p461_p11 }
  0x53   : > { %p468_p12 = por %p467_p2, %p466_p1 }
  0x55   : > { %p469_p0 = pnand %p468_p12, %p462_p5 }
  0xd9   : > { %v176_v9 = vpop.xlane.xlu0 %175 }
  0xda   : > { %v177_v10 = vmul.f32 0.00390625, %v176_v9 }
  0xdc   : > { %v192_v13 = vrot.slane %v177_v10, 7  ;;  %v210_v14 = vrot.slane %v177_v10, 1  ;;  %v208_v19 = vmul.f32 %v207_v12, %v177_v10 }
  0xde   : > { %v198_v16 = vsel %vm194_vm0, %v192_v13, 0.0  ;;  %v216_v17 = vsel %vm213_vm1, %v210_v14, 0.0 }
  0xdf   : > { %v200_v18 = vmul.f32 %v199_v11, %v198_v16  ;;  %v218_v21 = vmul.f32 %v217_v15, %v216_v17 }
  0xe1   : > { %v209_v20 = vadd.f32 %v208_v19, %v200_v18 }
  0xe3   : > { %v219_v22 = vadd.f32 %v218_v21, %v209_v20 }
  0xe5   : > { %v345_v23 = vmul.f32 -1.442695, %v219_v22 }
  0xe7   : > { %412 = vpow2.f32 %v345_v23 }
  0xf1   : > { %v413_v24 = vpop.eup %412 }
  0xf2   : > { %v223_v25 = vadd.f32 1.0, %v413_v24 }
  0xf4   : > { %414 = vrcp.f32 %v223_v25 }
  0xfe   : > { %v415_v26 = vpop.eup %414 }
  0xff   : > { %228 = vperm.xlu0 %411, %v415_v26  }
 0x17e   : > { %v229_v27 = vpop.permute.xlu0 %228 }
 0x17f   : > { %v231_v28 = vmul.f32 %v229_v27, %v172_v0  ;;  %v232_v29 = vmul.f32 %v229_v27, %v173_v1 }
 0x181   : > { %233 = vst [vmem:[%s171_s25] sm:$0xff] %v231_v28  ;;  %234 = vst [vmem:[%s171_s25 + $0x8] sm:$0xff] %v232_v29 }
 0x182   : > { %472 = shalt.err (!%p469_p0)
}
 0x183   : > { %s473_s8 = scalar_lea.hbm %s715_s29, 256  ;;  %s477_s21 = scalar_lea.hbm %s761_s2, 512 }
 0x184   : > { %p474_p3 = scmp.ne.s32.totalorder %s715_s29, %s473_s8  ;;  %p478_p6 = scmp.lt.u32.totalorder %s715_s29, %s761_s2 }
 0x185   : > { %p479_p13 = scmp.lt.u32.totalorder %s477_s21, %s473_s8  ;;  %p481_p8 = scmp.lt.u32.totalorder %s473_s8, %s715_s29 }
 0x186   : > { %p475_p7 = pnand %p474_p3, %p776_p9 }
 0x187   : > { %p480_p4 = por %p479_p13, %p478_p6 }
 0x188   : > { %p476_p10 = pneg %p475_p7 }
 0x189   : > { %p482_p11 = por %p481_p8, %p480_p4 }
 0x18b   : > { %p483_p5 = pnand %p482_p11, %p476_p10 }
 0x18d   : > { %486 = shalt.err (!%p483_p5)
}
 0x18e   : > { %359 = dma.vmem_to_hbm [thread:$0]  (%p776_p9), %s717_s26, 256, %s715_s29, %s236_s30  }
 0x18f PF: > { %s262_s17 = sand.u32 1, %s517_s9   ;;  %p777_p1 = scmp.ne.s32.totalorder %s766_s16, 0 }
 0x190   : > { %p778_p2 = scmp.ge.s32.totalorder %s529_s12, 2  ;;  %s263_s22 = scalar_lea.sflag [#allocation4], %s262_s17 }
 0x192   : > { %p370_p12 = pnand %p778_p2, %p777_p1 }
 0x194   : > { %512 = dma.done.wait (!%p370_p12), %s263_s22, 256  }
 0x195   : > { %514 = vsyncadd (!%p370_p12), %s263_s22, 4294967040  ;;  %p16_p0 = scmp.ge.s32.totalorder %s596_s18, 4   ;;  %s779_s9 = smov %s521_s10 }
 0x196   : > { %s780_s10 = smov %s525_s11  ;;  %s781_s11 = smov %s636_s5 }
 0x197   : > { %s782_s12 = smov %s596_s18  ;;  %18 = sbr.rel (!%p16_p0) target bundleno = 6 (0x6), region = 78 }
 0x19e   :  { %268 = vsyncpa [#allocation3], 1 }
 0x19f   :  { %270 = vsyncpa [#allocation3 + $0x1], 1 }
 0x1a0   :  { %271 = vsyncpa [#allocation4], 1 }
 0x1a1   :  { %273 = vsyncpa [#allocation4 + $0x1], 1 }
 0x1a2   :  { %274 = vsyncpa [#allocation5], 1 }
 0x1a3   :  { %276 = vsyncpa [#allocation5 + $0x1], 1 }

</bundles_post_ra>
